<compile_context>
chip_gen: v7x
topology: tpu7x:2x2x1
jax: 0.10.0
libtpu: 0.0.40
codegen_flags: <defaults>
</compile_context>

<pallas_src>
import functools

import jax
import jax.numpy as jnp
import numpy as np
from jax.experimental import pallas as pl
from jax.experimental.pallas import tpu as pltpu


def _conv3x3_relu_kernel(body_ref, halo_ref, w_ref, b_ref, o_ref, *, W, THW):
    # body_ref: [C, THW]    f32  -- TH image rows, flattened row-major (lane-dense)
    # halo_ref: [C, 2*W]    f32  -- row above (first W) / row below (last W);
    #                              zeros at the image border (built by wrapper)
    # w_ref:    [Cout, 9*C] f32  -- weights flattened in (kh, kw, c) order
    # b_ref:    [Cout, 1]   f32
    # o_ref:    [Cout, THW]      -- lane-dense output tile
    C = body_ref.shape[0]
    body = body_ref[...]
    halo = halo_ref[...]
    top, bot = halo[:, :W], halo[:, W:]

    zcol = jnp.zeros((C, 1), body.dtype)
    # ext[:, i] == x[c, r0 - 1 + (i - 1) // W, (i - 1) % W] of the row-padded
    # image strip, so conv tap (kh, kw) is the THW-wide slice at s = kh*W + kw.
    ext = jnp.concatenate([zcol, top, body, bot, zcol], axis=1)   # [C, THW+2W+2]

    lane = jax.lax.broadcasted_iota(jnp.int32, (1, THW), 1)
    col = lane % W
    keep_l = (col != 0).astype(body.dtype)       # kw == 0 taps: zero the w == 0 column
    keep_r = (col != W - 1).astype(body.dtype)   # kw == 2 taps: zero the w == W-1 column

    taps = []
    for kh in range(3):
        for kw in range(3):
            s = kh * W + kw
            t = ext[:, s:s + THW]
            if kw == 0:
                t = t * keep_l
            elif kw == 2:
                t = t * keep_r
            taps.append(t)
    patches = jnp.concatenate(taps, axis=0)      # [9*C, THW], K order = (kh, kw, c)

    acc = jnp.dot(w_ref[...], patches, preferred_element_type=jnp.float32)
    acc = acc + b_ref[...]                       # broadcast along lanes
    o_ref[...] = jnp.maximum(acc, 0.0).astype(o_ref.dtype)


def _choose_row_tile(H, W, *, lane_tile, min_tiles):
    """Largest TH | H with TH*W % 128 == 0, TH*W <= lane_tile and >= min_tiles tiles."""
    divs = [d for d in range(1, H + 1) if H % d == 0]
    aligned = [d for d in divs if (d * W) % 128 == 0]
    for want_tiles in (min_tiles, 1):
        cands = [d for d in aligned if d * W <= lane_tile and H // d >= want_tiles]
        if cands:
            return max(cands)
    if aligned:
        return min(aligned)          # aligned but larger than lane_tile
    return H                          # fall back: whole image per step (full-dim block)


def hidden_output_forward(x, weight, bias, *, lane_tile=8192, out_dtype=jnp.float32):
    """Conv2d(kernel=3, pad=1, stride=1) + ReLU + Flatten, NCHW semantics."""
    N, C, H, W = x.shape
    Cout, Cin, KH, KW = weight.shape
    assert Cin == C and KH == 3 and KW == 3

    HW = H * W
    K = C * KH * KW

    TH = _choose_row_tile(H, W, lane_tile=lane_tile, min_tiles=2)
    n_tiles = H // TH
    THW = TH * W

    x = x.astype(jnp.float32)
    x_flat = x.reshape(N, C, HW)                 # contiguous -> free reshape, no copy

    # Tiny halo-row array: for tile j, the image row just above / below it
    # (zeros at the top/bottom image border).  ~2/TH of the input in HBM.
    zrow = jnp.zeros((N, C, 1, W), x.dtype)
    if n_tiles > 1:
        tops = jnp.concatenate(
            [zrow, x[:, :, TH - 1::TH, :][:, :, :n_tiles - 1, :]], axis=2)
        bots = jnp.concatenate([x[:, :, TH::TH, :], zrow], axis=2)
    else:
        tops, bots = zrow, zrow
    halo = jnp.stack([tops, bots], axis=3)                        # [N, C, n_tiles, 2, W]
    halo = halo.transpose(0, 2, 1, 3, 4).reshape(N, n_tiles, C, 2 * W)

    # Flatten OIHW weights in (kh, kw, c) order to match the kernel's tap stacking.
    w_k = weight.astype(jnp.float32).transpose(0, 2, 3, 1).reshape(Cout, K)
    b_col = bias.astype(jnp.float32).reshape(Cout, 1)

    out = pl.pallas_call(
        functools.partial(_conv3x3_relu_kernel, W=W, THW=THW),
        out_shape=jax.ShapeDtypeStruct((N, Cout, HW), out_dtype),
        grid_spec=pltpu.PrefetchScalarGridSpec(
            num_scalar_prefetch=0,
            grid=(N, n_tiles),
            in_specs=[
                pl.BlockSpec((None, C, THW), lambda n, j: (n, 0, j)),
                pl.BlockSpec((None, None, C, 2 * W), lambda n, j: (n, j, 0, 0)),
                pl.BlockSpec((Cout, K), lambda n, j: (0, 0)),
                pl.BlockSpec((Cout, 1), lambda n, j: (0, 0)),
            ],
            out_specs=pl.BlockSpec((None, Cout, THW), lambda n, j: (n, 0, j)),
        ),
        compiler_params=pltpu.CompilerParams(
            dimension_semantics=("parallel", "parallel")),
    )(x_flat, halo, w_k, b_col)

    # nn.Flatten() on the NCHW conv output: contiguous -> free reshape, no copy.
    return out.reshape(N, Cout * HW)


if __name__ == "__main__":
    key = jax.random.PRNGKey(0)
    kx, kw_, kb = jax.random.split(key, 3)

    N, C, H, W = 2, 4, 16, 16
    Cout = 8

    x = jax.random.normal(kx, (N, C, H, W), dtype=jnp.float32)
    # Deterministic Conv2d parameter init (PyTorch-style uniform bound).
    fan_in = C * 3 * 3
    bound = 1.0 / np.sqrt(fan_in)
    weight = jax.random.uniform(kw_, (Cout, C, 3, 3), jnp.float32, -bound, bound)
    bias = jax.random.uniform(kb, (Cout,), jnp.float32, -bound, bound)

    y = hidden_output_forward(x, weight, bias)
    y = jax.block_until_ready(y)

    # Reference: XLA conv + ReLU + flatten (NCHW), to validate the kernel.
    ref = jax.lax.conv_general_dilated(
        x, weight, window_strides=(1, 1), padding=((1, 1), (1, 1)),
        dimension_numbers=("NCHW", "OIHW", "NCHW"))
    ref = jnp.maximum(ref + bias[None, :, None, None], 0.0).reshape(N, -1)

    assert y.shape == (N, Cout * H * W)
    err = float(np.max(np.abs(np.asarray(y) - np.asarray(ref))))
    # f32 end-to-end (f32 MXU accumulate) -> tight tolerance.
    assert np.allclose(np.asarray(y), np.asarray(ref), atol=2e-3, rtol=2e-3), err
    print("KERNEL_OK")
</pallas_src>

<mosaic_0001>
module attributes {stable_mosaic.version = 11 : i64} {
  func.func @_conv3x3_relu_kernel(%arg0: i32, %arg1: i32, %arg2: memref<1x4x128xf32, #tpu.memory_space<vmem>>, %arg3: memref<1x1x4x32xf32, #tpu.memory_space<vmem>>, %arg4: memref<8x36xf32, #tpu.memory_space<vmem>>, %arg5: memref<8x1xf32, #tpu.memory_space<vmem>>, %arg6: memref<1x8x128xf32, #tpu.memory_space<vmem>>) attributes {dimension_semantics = [#tpu.dimension_semantics<parallel>, #tpu.dimension_semantics<parallel>], iteration_bounds = array<i64: 2, 2>, scalar_prefetch = 0 : i64, scratch_operands = 0 : i64, tpu.core_type = #tpu.core_type<tc>, window_params = [{transform_indices = @transform_0, window_bounds = array<i64: 1, 4, 128>}, {transform_indices = @transform_1, window_bounds = array<i64: 1, 1, 4, 32>}, {pipeline_mode = #tpu.pipeline_mode<synchronous>, transform_indices = @transform_2, window_bounds = array<i64: 8, 36>}, {pipeline_mode = #tpu.pipeline_mode<synchronous>, transform_indices = @transform_3, window_bounds = array<i64: 8, 1>}, {transform_indices = @transform_4, window_bounds = array<i64: 1, 8, 128>}]} {
    %c0 = arith.constant 0 : index
    %c0_0 = arith.constant 0 : index
    %c0_1 = arith.constant 0 : index
    %0 = vector.load %arg2[%c0, %c0_0, %c0_1] : memref<1x4x128xf32, #tpu.memory_space<vmem>>, vector<1x4x128xf32>
    %1 = vector.shape_cast %0 : vector<1x4x128xf32> to vector<4x128xf32>
    %c0_2 = arith.constant 0 : index
    %c0_3 = arith.constant 0 : index
    %c0_4 = arith.constant 0 : index
    %c0_5 = arith.constant 0 : index
    %2 = vector.load %arg3[%c0_2, %c0_3, %c0_4, %c0_5] : memref<1x1x4x32xf32, #tpu.memory_space<vmem>>, vector<1x1x4x32xf32>
    %3 = vector.shape_cast %2 : vector<1x1x4x32xf32> to vector<4x32xf32>
    %4 = vector.extract_strided_slice %3 {offsets = [0, 0], sizes = [4, 16], strides = [1, 1]} : vector<4x32xf32> to vector<4x16xf32>
    %5 = vector.extract_strided_slice %3 {offsets = [0, 16], sizes = [4, 16], strides = [1, 1]} : vector<4x32xf32> to vector<4x16xf32>
    %cst = arith.constant 0.000000e+00 : f32
    %6 = vector.broadcast %cst : f32 to vector<4x1xf32>
    %7 = tpu.concatenate %6, %4, %1, %5, %6 in 1 : vector<4x1xf32>, vector<4x16xf32>, vector<4x128xf32>, vector<4x16xf32>, vector<4x1xf32> -> vector<4x162xf32>
    %8 = tpu.iota {dimensions = array<i32: 1>} : vector<1x128xi32>
    %c16_i32 = arith.constant 16 : i32
    %c0_i32 = arith.constant 0 : i32
    %9 = arith.cmpi eq, %c16_i32, %c0_i32 : i32
    %c1_i32 = arith.constant 1 : i32
    %10 = arith.select %9, %c1_i32, %c16_i32 : i32
    %11 = vector.broadcast %10 : i32 to vector<1x128xi32>
    %12 = arith.remsi %8, %11 : vector<1x128xi32>
    %c0_i32_6 = arith.constant 0 : i32
    %13 = vector.broadcast %c0_i32_6 : i32 to vector<1x128xi32>
    %14 = arith.cmpi ne, %12, %13 : vector<1x128xi32>
    %c0_i32_7 = arith.constant 0 : i32
    %15 = vector.broadcast %c0_i32_7 : i32 to vector<1x128xi32>
    %16 = arith.cmpi slt, %12, %15 : vector<1x128xi32>
    %c0_i32_8 = arith.constant 0 : i32
    %17 = arith.cmpi slt, %10, %c0_i32_8 : i32
    %18 = vector.broadcast %17 : i1 to vector<1x128xi1>
    %19 = vector.broadcast %18 : vector<1x128xi1> to vector<1x128xi1>
    %20 = arith.xori %16, %19 : vector<1x128xi1>
    %21 = arith.andi %20, %14 : vector<1x128xi1>
    %22 = vector.broadcast %10 : i32 to vector<1x128xi32>
    %23 = arith.addi %12, %22 : vector<1x128xi32>
    %24 = arith.select %21, %23, %12 : vector<1x128xi1>, vector<1x128xi32>
    %c0_i32_9 = arith.constant 0 : i32
    %25 = vector.broadcast %c0_i32_9 : i32 to vector<1x128xi32>
    %26 = arith.cmpi ne, %24, %25 : vector<1x128xi32>
    %27 = arith.extui %26 : vector<1x128xi1> to vector<1x128xi32>
    %28 = arith.sitofp %27 : vector<1x128xi32> to vector<1x128xf32>
    %c15_i32 = arith.constant 15 : i32
    %29 = vector.broadcast %c15_i32 : i32 to vector<1x128xi32>
    %30 = arith.cmpi ne, %24, %29 : vector<1x128xi32>
    %31 = arith.extui %30 : vector<1x128xi1> to vector<1x128xi32>
    %32 = arith.sitofp %31 : vector<1x128xi32> to vector<1x128xf32>
    %33 = vector.extract_strided_slice %7 {offsets = [0, 0], sizes = [4, 128], strides = [1, 1]} : vector<4x162xf32> to vector<4x128xf32>
    %34 = vector.broadcast %28 : vector<1x128xf32> to vector<4x128xf32>
    %35 = arith.mulf %33, %34 : vector<4x128xf32>
    %36 = vector.extract_strided_slice %7 {offsets = [0, 1], sizes = [4, 128], strides = [1, 1]} : vector<4x162xf32> to vector<4x128xf32>
    %37 = vector.extract_strided_slice %7 {offsets = [0, 2], sizes = [4, 128], strides = [1, 1]} : vector<4x162xf32> to vector<4x128xf32>
    %38 = vector.broadcast %32 : vector<1x128xf32> to vector<4x128xf32>
    %39 = arith.mulf %37, %38 : vector<4x128xf32>
    %40 = vector.extract_strided_slice %7 {offsets = [0, 16], sizes = [4, 128], strides = [1, 1]} : vector<4x162xf32> to vector<4x128xf32>
    %41 = vector.broadcast %28 : vector<1x128xf32> to vector<4x128xf32>
    %42 = arith.mulf %40, %41 : vector<4x128xf32>
    %43 = vector.extract_strided_slice %7 {offsets = [0, 17], sizes = [4, 128], strides = [1, 1]} : vector<4x162xf32> to vector<4x128xf32>
    %44 = vector.extract_strided_slice %7 {offsets = [0, 18], sizes = [4, 128], strides = [1, 1]} : vector<4x162xf32> to vector<4x128xf32>
    %45 = vector.broadcast %32 : vector<1x128xf32> to vector<4x128xf32>
    %46 = arith.mulf %44, %45 : vector<4x128xf32>
    %47 = vector.extract_strided_slice %7 {offsets = [0, 32], sizes = [4, 128], strides = [1, 1]} : vector<4x162xf32> to vector<4x128xf32>
    %48 = vector.broadcast %28 : vector<1x128xf32> to vector<4x128xf32>
    %49 = arith.mulf %47, %48 : vector<4x128xf32>
    %50 = vector.extract_strided_slice %7 {offsets = [0, 33], sizes = [4, 128], strides = [1, 1]} : vector<4x162xf32> to vector<4x128xf32>
    %51 = vector.extract_strided_slice %7 {offsets = [0, 34], sizes = [4, 128], strides = [1, 1]} : vector<4x162xf32> to vector<4x128xf32>
    %52 = vector.broadcast %32 : vector<1x128xf32> to vector<4x128xf32>
    %53 = arith.mulf %51, %52 : vector<4x128xf32>
    %54 = tpu.concatenate %35, %36, %39, %42, %43, %46, %49, %50, %53 in 0 : vector<4x128xf32>, vector<4x128xf32>, vector<4x128xf32>, vector<4x128xf32>, vector<4x128xf32>, vector<4x128xf32>, vector<4x128xf32>, vector<4x128xf32>, vector<4x128xf32> -> vector<36x128xf32>
    %c0_10 = arith.constant 0 : index
    %c0_11 = arith.constant 0 : index
    %55 = vector.load %arg4[%c0_10, %c0_11] : memref<8x36xf32, #tpu.memory_space<vmem>>, vector<8x36xf32>
    %cst_12 = arith.constant dense<0.000000e+00> : vector<8x128xf32>
    %56 = tpu.matmul %55, %54, %cst_12 {dimension_numbers = #tpu.dot_dimension_numbers<[1], [0], [0], [1], [0, 0, 1, 1], [], []>} : vector<8x36xf32>, vector<36x128xf32>, vector<8x128xf32> -> vector<8x128xf32>
    %c0_13 = arith.constant 0 : index
    %c0_14 = arith.constant 0 : index
    %57 = vector.load %arg5[%c0_13, %c0_14] : memref<8x1xf32, #tpu.memory_space<vmem>>, vector<8x1xf32>
    %58 = vector.broadcast %57 : vector<8x1xf32> to vector<8x128xf32>
    %59 = arith.addf %56, %58 : vector<8x128xf32>
    %cst_15 = arith.constant 0.000000e+00 : f32
    %60 = vector.broadcast %cst_15 : f32 to vector<8x128xf32>
    %61 = arith.maximumf %59, %60 : vector<8x128xf32>
    %c0_16 = arith.constant 0 : index
    %c0_17 = arith.constant 0 : index
    %c0_18 = arith.constant 0 : index
    %62 = vector.load %arg6[%c0_16, %c0_17, %c0_18] : memref<1x8x128xf32, #tpu.memory_space<vmem>>, vector<1x8x128xf32>
    %63 = vector.shape_cast %62 : vector<1x8x128xf32> to vector<8x128xf32>
    %64 = vector.shape_cast %61 : vector<8x128xf32> to vector<1x8x128xf32>
    tpu.vector_store %arg6[%c0_16, %c0_17, %c0_18], %64 {strides = array<i32>} : memref<1x8x128xf32, #tpu.memory_space<vmem>>, vector<1x8x128xf32>,
    return
  }
  func.func @transform_0(%arg0: i32, %arg1: i32) -> (i32, i32, i32) {
    %c0_i32 = arith.constant 0 : i32
    %c0_i32_0 = arith.constant 0 : i32
    return %arg0, %c0_i32, %arg1 : i32, i32, i32
  }
  func.func @transform_1(%arg0: i32, %arg1: i32) -> (i32, i32, i32, i32) {
    %c0_i32 = arith.constant 0 : i32
    %c0_i32_0 = arith.constant 0 : i32
    %c0_i32_1 = arith.constant 0 : i32
    return %arg0, %arg1, %c0_i32, %c0_i32_0 : i32, i32, i32, i32
  }
  func.func @transform_2(%arg0: i32, %arg1: i32) -> (i32, i32) {
    %c0_i32 = arith.constant 0 : i32
    %c0_i32_0 = arith.constant 0 : i32
    %c0_i32_1 = arith.constant 0 : i32
    return %c0_i32, %c0_i32_0 : i32, i32
  }
  func.func @transform_3(%arg0: i32, %arg1: i32) -> (i32, i32) {
    %c0_i32 = arith.constant 0 : i32
    %c0_i32_0 = arith.constant 0 : i32
    %c0_i32_1 = arith.constant 0 : i32
    return %c0_i32, %c0_i32_0 : i32, i32
  }
  func.func @transform_4(%arg0: i32, %arg1: i32) -> (i32, i32, i32) {
    %c0_i32 = arith.constant 0 : i32
    %c0_i32_0 = arith.constant 0 : i32
    return %arg0, %c0_i32, %arg1 : i32, i32, i32
  }
}

</mosaic_0001>

<bundles_post_ra>
// kernel: tpu_custom_call.1
= control target key start
LH: loop header
LB: loop body
LE: loop exit
PB: predicated region body
PF: predicated region fallthrough
CT: control target
= control target key end

     0   :  { %s1301_s0 = inlined_call_operand.hbm [shape: f32[2,4,256], index: 0, kind: input, shape index: {}]   ;;  %s1302_s1 = inlined_call_operand.hbm [shape: f32[2,2,4,32], index: 1, kind: input, shape index: {}]   ;;  %s1303_s2 = inlined_call_operand.vmem [shape: f32[8,36], index: 2, kind: input, shape index: {}]   ;;  %s1304_s3 = inlined_call_operand.vmem [shape: f32[8,1], index: 3, kind: input, shape index: {}]   ;;  %s1305_s4 = inlined_call_operand.hbm [shape: f32[2,8,256], index: 4, kind: output, shape index: {}]  }
   0x1   :  { %1311 = sst [smem:[#allocation12_spill]] %s1301_s0 }
   0x2   :  { %9 = vsyncpa [#allocation3], 0 }
   0x3   :  { %11 = vsyncpa [#allocation3 + $0x1], 0 }
   0x4   :  { %12 = vsyncpa [#allocation6], 0 }
   0x5   :  { %14 = vsyncpa [#allocation6 + $0x1], 0 }
   0x6   :  { %15 = vsyncpa [#allocation4], 0 }
   0x7   :  { %17 = vsyncpa [#allocation4 + $0x1], 0  ;;  %s1023_s15 = smov 0   ;;  %s1025_s16 = smov 0  }
   0x8   :  { %s1027_s17 = smov 0   ;;  %s1029_s18 = smov 0  }
   0x9   :  { %s1031_s19 = smov 0   ;;  %s1033_s20 = smov 0  }
   0xa   :  { %s1035_s21 = smov 0   ;;  %s1037_s22 = smov 0  }
   0xb LB: > { %s626_s23 = sadd.s32 4294967295, %s974_s22   ;;  %s627_s24 = sadd.s32 4294967294, %s974_s22   ;;  %s974_s22 = sphi %s1037_s22, %s23_s22   ;;  %s970_s21 = sphi %s1035_s21, %s1335_s21   ;;  %s966_s20 = sphi %s1033_s20, %s1334_s20   ;;  %s962_s19 = sphi %s1031_s19, %s1333_s19   ;;  %s958_s18 = sphi %s1029_s18, %s1332_s18   ;;  %s954_s17 = sphi %s1027_s17, %s1331_s17   ;;  %s950_s16 = sphi %s1025_s16, %s1330_s16   ;;  %s946_s15 = sphi %s1023_s15, %s1329_s15  }
   0xc   : > { %s32_s25 = sadd.s32 1, %s966_s20  ;;  %s35_s26 = sadd.s32 1, %s970_s21 }
   0xd   : > { %p33_p0 = scmp.ge.s32.totalorder %s32_s25, 2  ;;  %s44_s27 = sadd.s32 1, %s954_s17 }
   0xe   : > { %p51_p1 = scmp.ne.s32.totalorder %s954_s17, %s950_s16  ;;  %p52_p2 = scmp.eq.s32.totalorder %s974_s22, 0 }
   0xf   : > { %s1337_s25 = smov (%p33_p0, %s32_s25), 0  ;;  %s1339_s26 = smov (!%p33_p0, %s35_s26), %s970_s21 }
  0x10   : > { %s40_s28 = ssub.s32 %s966_s20, %s1337_s25  ;;  %p1076_p3 = por %p52_p2, %p51_p1 }
  0x11   : > { %p37_p4 = scmp.ge.s32.totalorder %s1339_s26, 2  ;;  %p57_p5 = scmp.ne.s32.totalorder %s950_s16, %s946_s15 }
  0x12   : > { %p58_p6 = scmp.eq.s32.totalorder %s626_s23, 0  ;;  %p153_p7 = scmp.eq.s32.totalorder %s626_s23, 3 }
  0x13   : > { %s1341_s26 = smov (%p37_p4, %s1339_s26), 0  ;;  %p159_p10 = scmp.eq.s32.totalorder %s627_s24, 3 }
  0x14   : > { %1313 = sst [smem:[#allocation11_spill]] %s1341_s26  ;;  %p1084_p8 = por %p58_p6, %p57_p5 }
  0x15   : > { %p1088_p9 = por %p153_p7, %p51_p1  ;;  %s39_s6 = ssub.s32 %s970_s21, %s1341_s26 }
  0x16   : > { %s1314_s30 = scalar_select %p1084_p8, 1, 0 }
  0x17   : > { %s1315_s5 = scalar_select %p1088_p9, 1, 0 }
  0x18   : > { %s41_s7 = sor.u32 %s40_s28, %s39_s6  ;;  %p1094_p12 = por %p159_p10, %p57_p5 }
  0x19   : > { %p42_p11 = scmp.eq.s32.totalorder %s41_s7, 0  ;;  %p691_p13 = scmp.lt.s32.totalorder %s974_s22, 4 }
  0x1a   : > { %s1316_s8 = scalar_select %p1094_p12, 1, 0 }
  0x1b   : > { %s1100_s9 = sand.u32 1, %s954_s17   ;;  %s631_s12 = sshll.u32 %s970_s21, 1 }
  0x1c   : > { %s1103_s10 = scalar_select %p42_p11, %s954_s17, %s44_s27  }
  0x1d   : > { %s1306_s11 = sshll.u32 %s1100_s9, 2  ;;  %s1108_s13 = sadd.s32 %s966_s20, %s631_s12 }
  0x1e   : > { %s189_s14 = scalar_lea.vmem [#allocation2], %s1306_s11  ;;  %s1307_s24 = sshll.u32 %s1108_s13, 6 }
  0x1f   : > { %s198_s23 = sshll.u32 %s189_s14, 4  ;;  %s1317_s0 = sld [smem:[#allocation12_spill]]  ;;  %s1113_s23 = int_to_ptr.vmem [resolvable:$true] %s198_s23 }
  0x20   : > { %p1124_p0 = pnand %p691_p13, %p1076_p3  ;;  %s186_s12 = scalar_lea.sflag [#allocation3], %s1100_s9 }
  0x22   : > { %p814_p5 = pneg %p1124_p0 }
  0x25   : > { %s1120_s7 = scalar_lea.hbm %s1317_s0, %s1307_s24  ;;  %s817_s6 = scalar_lea.hbm %s1317_s0, 256 }
  0x26   : > { %s812_s14 = scalar_lea.hbm %s1120_s7, 64  ;;  %p818_p3 = scmp.lt.u32.totalorder %s1120_s7, %s1317_s0 }
  0x27   : > { %p813_p4 = scmp.ne.s32.totalorder %s1120_s7, %s812_s14  ;;  %p819_p10 = scmp.lt.u32.totalorder %s817_s6, %s812_s14 }
  0x28   : > { %p821_p13 = scmp.lt.u32.totalorder %s812_s14, %s1120_s7 }
  0x29   : > { %p815_p6 = pnand %p814_p5, %p813_p4  ;;  %p820_p11 = por %p819_p10, %p818_p3 }
  0x2b   : > { %p816_p7 = pneg %p815_p6  ;;  %p822_p1 = por %p821_p13, %p820_p11 }
  0x2d   : > { %p823_p2 = pnand %p822_p1, %p816_p7 }
  0x2f   : > { %826 = shalt.err (!%p823_p2)
}
  0x30   : > { %s827_s26 = scalar_lea.vmem %s1113_s23, 64  ;;  %s976_s29 = smov [#allocation2]  }
  0x31   : > { %p828_p4 = scmp.ne.s32.totalorder %s1113_s23, %s827_s26  ;;  %s832_s28 = sshll.u32 %s976_s29, 4  ;;  %s833_s28 = int_to_ptr.vmem [resolvable:$false] %s832_s28 }
  0x32   : > { %s834_s11 = scalar_lea.vmem %s833_s28, 128  ;;  %p835_p9 = scmp.lt.s32.totalorder %s1113_s23, %s833_s28 }
  0x33   : > { %p830_p6 = pnand %p828_p4, %p814_p5  ;;  %p836_p3 = scmp.lt.s32.totalorder %s834_s11, %s827_s26 }
  0x35   : > { %p831_p12 = pneg %p830_p6  ;;  %p837_p10 = por %p836_p3, %p835_p9 }
  0x37   : > { %p838_p11 = pnand %p837_p10, %p831_p12 }
  0x39   : > { %841 = shalt.err (!%p838_p11)
}
  0x3a   : > { %683 = dma.hbm_to_vmem [thread:$0]  (!%p1124_p0), %s1120_s7, 64, %s1113_s23, %s186_s12  }
  0x3b   : > { %p1319_p1 = scmp.lt.s32.totalorder %s974_s22, 5  ;;  %p1320_p2 = scmp.ge.s32.totalorder %s974_s22, 1 }
  0x3c   : > { %s1322_s26 = sshll.u32 %s1108_s13, 6  ;;  %s1323_s28 = sshll.u32 %s1100_s9, 2 }
  0x3d   : > { %p1160_p7 = pnand %p1320_p2, %p1319_p1  ;;  %s1169_s29 = scalar_lea.hbm %s1302_s1, %s1322_s26 }
  0x3e   : > { %s209_s11 = scalar_lea.vmem [#allocation5], %s1323_s28  ;;  %s206_s23 = scalar_lea.sflag [#allocation6], %s1100_s9 }
  0x3f   : > { %s1321_s24 = scalar_select %p1160_p7, 1, 0 }
  0x40   : > { %s218_s0 = sshll.u32 %s209_s11, 4  ;;  %s842_s7 = scalar_lea.hbm %s1169_s29, 64  ;;  %s219_s0 = int_to_ptr.vmem [resolvable:$true] %s218_s0 }
  0x41   : > { %p843_p9 = scmp.ne.s32.totalorder %s1169_s29, %s842_s7  ;;  %s847_s26 = scalar_lea.hbm %s1302_s1, 256 }
  0x42   : > { %p848_p4 = scmp.lt.u32.totalorder %s1169_s29, %s1302_s1  ;;  %p849_p6 = scmp.lt.u32.totalorder %s847_s26, %s842_s7 }
  0x43   : > { %p845_p12 = pnand %p843_p9, %p814_p5  ;;  %p851_p10 = scmp.lt.u32.totalorder %s842_s7, %s1169_s29 }
  0x44   : > { %p850_p3 = por %p849_p6, %p848_p4 }
  0x45   : > { %p846_p13 = pneg %p845_p12 }
  0x46   : > { %p852_p11 = por %p851_p10, %p850_p3 }
  0x48   : > { %p853_p1 = pnand %p852_p11, %p846_p13 }
  0x4a   : > { %856 = shalt.err (!%p853_p1)
}
  0x4b   : > { %s857_s9 = scalar_lea.vmem %s219_s0, 64  ;;  %s977_s28 = smov [#allocation5]  }
  0x4c   : > { %p858_p2 = scmp.ne.s32.totalorder %s219_s0, %s857_s9  ;;  %s862_s11 = sshll.u32 %s977_s28, 4  ;;  %s863_s11 = int_to_ptr.vmem [resolvable:$false] %s862_s11 }
  0x4d   : > { %s864_s13 = scalar_lea.vmem %s863_s11, 128  ;;  %p865_p8 = scmp.lt.s32.totalorder %s219_s0, %s863_s11 }
  0x4e   : > { %p860_p9 = pnand %p858_p2, %p814_p5  ;;  %p866_p7 = scmp.lt.s32.totalorder %s864_s13, %s857_s9 }
  0x50   : > { %p861_p12 = pneg %p860_p9  ;;  %p867_p4 = por %p866_p7, %p865_p8 }
  0x52   : > { %p868_p6 = pnand %p867_p4, %p861_p12 }
  0x54   : > { %871 = shalt.err (!%p868_p6)
}
  0x55   : > { %686 = dma.hbm_to_vmem [thread:$0]  (!%p1124_p0), %s1169_s29, 64, %s219_s0, %s206_s23  }
  0x56   : > { %p1324_p13 = scmp.ne.s32.totalorder %s1321_s24, 0 }
  0x57   : > { %s1196_s7 = sand.u32 (!%p1324_p13), 1, %s950_s16   ;;  %p1325_p5 = scmp.ne.s32.totalorder (!%p1324_p13), %s1314_s30, 0 }
  0x58   : > { %227 = sbr.rel (%p1324_p13) target bundleno = 592 (0x250), region = 36  ;;  %s637_s12 = sshll.u32 (!%p1324_p13), %s1196_s7, 2 }
  0x59   : > { %s230_s26 = scalar_lea.sflag (!%p1324_p13), [#allocation3], %s1196_s7  ;;  %s233_s14 = scalar_lea.vmem (!%p1324_p13), [#allocation2], %s637_s12 }
  0x5f   : > { %933 = dma.done.wait (%p1325_p5), %s230_s26, 64  }
  0x60   : > { %935 = vsyncadd (%p1325_p5), %s230_s26, 4294967232  ;;  %s239_s0 = scalar_lea.sflag [#allocation6], %s1196_s7  ;;  %s242_s27 = scalar_lea.vmem [#allocation5], %s637_s12 }
  0x61   : > { %937 = dma.done.wait (%p1325_p5), %s239_s0, 64  }
  0x62   : > { %939 = vsyncadd (%p1325_p5), %s239_s0, 4294967232  ;;  %v289_v0 = vlaneseq  ;;  %v978_v3 = vmov 0.0   ;;  %v273_v5 = vld [vmem:[%s242_s27] sm:$0xf]  ;;  %s979_s24 = smov 16   ;;  %s980_s29 = smov 1  }
  0x63   : > { %275 = vrot.lane.b32.xlu0 %v273_v5, %s980_s29  ;;  %v272_v7 = vld [vmem:[%s233_s14] sm:$0xf]  ;;  %s981_s30 = smov 2   ;;  %s982_s23 = smov 17   ;;  %vm282_vm2 = vcmask 7168   ;;  %vm284_vm3 = vcmask 138240  }
  0x64   : > { %v290_v1 = vand.u32 127, %v289_v0  ;;  %s983_s6 = smov 32   ;;  %s984_s9 = smov 18   ;;  %vm287_vm4 = vcmask 269312   ;;  %v987_v30 = vmov 0.0|0.0   ;;  %vm994_vm5 = vmmov 0  }
  0x65   : > { %s985_s28 = smov 34   ;;  %s986_s11 = smov 111   ;;  %668 = vmatprep.subr.bf16.mxu0 %v987_v30  ;;  %665 = vmatprep.mubr.msk.f32.mxu0 %vm994_vm5, %v978_v3  ;;  %v416_v41 = vld [vmem:[%s1304_s3] sm:$0xff]  ;;  %v995_v42 = vmov 0   ;;  %vm345_vm6 = vcmask 1039360   ;;  %vm354_vm7 = vcmask 1031168  }
  0x66   : > { %v295_v2 = vand.u32 15, %v290_v1  ;;  %s988_s13 = smov 127   ;;  %s989_s12 = smov 126   ;;  %811 = vset.pattern.permute.xlu0 %v995_v42  ;;  %vm365_vm8 = vcmask 916480   ;;  %vm410_vm9 = vcmask 1043456   ;;  %vm383_vm10 = vcmask 900096  }
  0x67   : > { %279 = vrot.lane.b32.xlu0 %v272_v7, %s982_s23  ;;  %s990_s26 = smov 112   ;;  %s991_s14 = smov 96   ;;  %vm372_vm11 = vcmask 908288   ;;  %vm392_vm12 = vcmask 785408   ;;  %vm399_vm13 = vcmask 777216   ;;  %vm408_vm14 = vcmask 769024  }
  0x68   : > { %vm303_vm0 = vcmp.ne.s32.totalorder %v295_v2, 0  ;;  %vm306_vm1 = vcmp.ne.s32.totalorder %v295_v2, 15  ;;  %s992_s0 = smov 110   ;;  %s993_s27 = smov 94   ;;  %vm422_vm15 = vcmask 293888  }
  0x69   : > { %v1210_v4 = vsel %vm303_vm0, 1.0, %v978_v3  ;;  %v641_v6 = vsel %vm306_vm1, 1.0, %v978_v3  ;;  %p1326_p0 = scmp.ne.s32.totalorder %s1315_s5, 0 }
  0x6a   : > { %317 = vrot.lane.b32.xlu1 %v1210_v4, %s979_s24  ;;  %s997_s24 = smov [#allocation7]  }
  0x6b   : > { %322 = vrot.lane.b32.xlu0 %v641_v6, %s984_s9  ;;  %s639_s9 = sshll.u32 %s1196_s7, 3  ;;  %s876_s29 = sshll.u32 %s997_s24, 4  ;;  %s877_s29 = int_to_ptr.vmem [resolvable:$false] %s876_s29 }
  0x6e   : > { %311 = vrot.lane.b32.xlu1 %v641_v6, %s981_s30  ;;  %s996_s30 = smov 95  }
  0x6f   : > { %332 = vrot.lane.b32.xlu0 %v641_v6, %s985_s28  ;;  %s645_s28 = sshll.u32 %s962_s19, 1 }
  0x72   : > { %327 = vrot.lane.b32.xlu1 %v1210_v4, %s983_s6 }
  0xd5   : > { %v276_v9 = vpop.permute.xlu0 %275 }
  0xd6   : > { %v283_v10 = vsel %vm282_vm2, 0.0, %v276_v9 }
  0xd9   : > { %v280_v12 = vpop.permute.xlu0 %279 }
  0xda   : > { %v1215_v13 = vsel %vm284_vm3, %v283_v10, %v280_v12  ;;  %v286_v14 = vsel %vm284_vm3, %v280_v12, %v276_v9 }
  0xdb   : > { %v288_v15 = vsel %vm287_vm4, %v286_v14, 0.0  ;;  %v339_v16 = vrot.slane %v1215_v13, 4  ;;  %v309_v55 = vmul.f32 %v1210_v4, %v1215_v13 }
  0xdc   : > { %v318_v8 = vpop.permute.xlu1 %317  ;;  %v776_v19 = vpack.i.bf16 %v288_v15, %v1215_v13  ;;  %v340_v20 = vrot.slane %v288_v15, 4 }
  0xdd   : > { %v320_v18 = vmul.f32 %v318_v8, %v1215_v13  ;;  %v321_v22 = vmul.f32 %v318_v8, %v288_v15  ;;  %v323_v24 = vpop.permute.xlu0 %322 }
  0xde   : > { %777 = vrot.lane.b32.xlu0 %v776_v19, %s986_s11  ;;  %v325_v26 = vmul.f32 %v323_v24, %v1215_v13  ;;  %v326_v27 = vmul.f32 %v323_v24, %v288_v15  ;;  %v781_v28 = vpack.i.bf16 %v340_v20, %v339_v16  ;;  %s512_s11 = sadd.s32 %s958_s18, %s645_s28  ;;  %s501_s18 = scalar_lea.sflag [#allocation4], %s1196_s7 }
  0xdf   : > { %v359_v25 = vrot.slane %v320_v18, 4  ;;  %v360_v29 = vrot.slane %v321_v22, 4  ;;  %v415_v18 = vld [vmem:[%s1303_s2] sm:$0xff] }
  0xe0   : > { %v312_v11 = vpop.permute.xlu1 %311  ;;  %782 = vrot.lane.b32.xlu1 %v781_v28, %s988_s13  ;;  %v377_v34 = vrot.slane %v325_v26, 4  ;;  %v378_v35 = vrot.slane %v326_v27, 4  ;;  %s646_s13 = sshll.u32 %s512_s11, 7 }
  0xe1   : > { %v314_v17 = vmul.f32 %v312_v11, %v1215_v13  ;;  %v315_v21 = vmul.f32 %v312_v11, %v288_v15  ;;  %v796_v36 = vpack.i.bf16 %v360_v29, %v359_v25  ;;  %v333_v38 = vpop.permute.xlu0 %332 }
  0xe2   : > { %v801_v39 = vpack.i.bf16 %v378_v35, %v377_v34  ;;  %v335_v40 = vmul.f32 %v333_v38, %v1215_v13  ;;  %v336_v43 = vmul.f32 %v333_v38, %v288_v15 }
  0xe3   : > { %v786_v33 = vpack.i.bf16 %v315_v21, %v314_v17 }
  0xe4   : > { %v328_v23 = vpop.permute.xlu1 %327  ;;  %797 = vrot.lane.b32.xlu1 %v796_v36, %s990_s26 }
  0xe5   : > { %v330_v31 = vmul.f32 %v328_v23, %v1215_v13  ;;  %v331_v32 = vmul.f32 %v328_v23, %v288_v15  ;;  %787 = vrot.lane.b32.xlu0 %v786_v33, %s989_s12  ;;  %s271_s12 = scalar_lea.vmem [#allocation7], %s639_s9 }
  0xe6   : > { %s516_s26 = sshll.u32 %s271_s12, 4  ;;  %s1249_s26 = int_to_ptr.vmem [resolvable:$true] %s516_s26 }
  0xe7   : > { %v791_v37 = vpack.i.bf16 %v331_v32, %v330_v31  ;;  %s872_s19 = scalar_lea.vmem %s1249_s26, 128  ;;  %p879_p10 = scmp.lt.s32.totalorder %s1249_s26, %s877_s29 }
  0xe8   : > { %802 = vrot.lane.b32.xlu1 %v801_v39, %s992_s0  ;;  %p873_p8 = scmp.ne.s32.totalorder %s1249_s26, %s872_s19 }
  0xe9   : > { %792 = vrot.lane.b32.xlu0 %v791_v37, %s991_s14 }
  0xea   : > { %p874_p7 = pnand %p873_p8, %p1326_p0 }
  0xec   : > { %807 = vrot.lane.b32.xlu1 %v781_v28, %s996_s30  ;;  %p875_p3 = pneg %p874_p7  ;;  %s878_s30 = scalar_lea.vmem %s877_s29, 256 }
  0xed   : > { %404 = vrot.lane.b32.xlu0 %v335_v40, %s993_s27  ;;  %p880_p11 = scmp.lt.s32.totalorder %s878_s30, %s872_s19 }
  0xef   : > { %p881_p1 = por %p880_p11, %p879_p10 }
  0xf0   : > { %406 = vrot.lane.b32.xlu1 %v336_v43, %s993_s27  ;;  %s1247_s27 = scalar_lea.hbm %s1305_s4, %s646_s13 }
  0xf1   : > { %419 = vperm.xlu0 %811, %v416_v41   ;;  %p882_p2 = pnand %p881_p1, %p875_p3 }
 0x150   : > { %v778_v44 = vpop.permute.xlu0 %777 }
 0x151   : > { %v780_v1 = vunpack.i.h.bf16 %v778_v44  ;;  %v779_v2 = vunpack.i.l.bf16 %v778_v44 }
 0x152   : > { %v783_v45 = vpop.permute.xlu1 %782 }
 0x153   : > { %v785_v46 = vunpack.i.h.bf16 %v783_v45  ;;  %v784_v47 = vunpack.i.l.bf16 %v783_v45  ;;  %v373_v10 = vsel %vm372_vm11, %v779_v2, %v780_v1 }
 0x155   : > { %v346_v54 = vsel %vm345_vm6, %v784_v47, %v785_v46 }
 0x156   : > { %v798_v51 = vpop.permute.xlu1 %797  ;;  %v411_v60 = vsel %vm410_vm9, %v309_v55, %v346_v54 }
 0x157   : > { %v788_v48 = vpop.permute.xlu0 %787  ;;  %v800_v52 = vunpack.i.h.bf16 %v798_v51  ;;  %v799_v53 = vunpack.i.l.bf16 %v798_v51 }
 0x158   : > { %v790_v49 = vunpack.i.h.bf16 %v788_v48  ;;  %v789_v50 = vunpack.i.l.bf16 %v788_v48 }
 0x159   : > { %v366_v57 = vsel %vm365_vm8, %v799_v53, %v800_v52 }
 0x15a   : > { %v355_v56 = vsel %vm354_vm7, %v789_v50, %v790_v49  ;;  %v803_v59 = vpop.permute.xlu1 %802 }
 0x15b   : > { %v793_v58 = vpop.permute.xlu0 %792  ;;  %v412_v61 = vsel %vm410_vm9, %v355_v56, %v366_v57  ;;  %v805_v62 = vunpack.i.h.bf16 %v803_v59  ;;  %v804_v63 = vunpack.i.l.bf16 %v803_v59 }
 0x15c   : > { %v669_v0 = vpack.c.bf16 %v412_v61, %v411_v60  ;;  %v795_v5 = vunpack.i.h.bf16 %v793_v58  ;;  %v794_v6 = vunpack.i.l.bf16 %v793_v58 }
 0x15d   : > { %v384_v7 = vsel %vm383_vm10, %v804_v63, %v805_v62 }
 0x15e   : > { %670 = vmatpush3.bf16.msra.mxu0 %v669_v0  ;;  %v808_v4 = vpop.permute.xlu1 %807  ;;  %v393_v11 = vsel %vm392_vm12, %v794_v6, %v795_v5  ;;  %v413_v13 = vsel %vm410_vm9, %v373_v10, %v384_v7 }
 0x15f   : > { %671 = vmatprep.subr.bf16.mxu0 %v987_v30  ;;  %v810_v8 = vunpack.i.h.bf16 %v808_v4  ;;  %v809_v9 = vunpack.i.l.bf16 %v808_v4  ;;  %v405_v17 = vpop.permute.xlu0 %404 }
 0x161   : > { %v400_v12 = vsel %vm399_vm13, %v809_v9, %v810_v8 }
 0x162   : > { %v414_v14 = vsel %vm410_vm9, %v393_v11, %v400_v12  ;;  %v407_v16 = vpop.permute.xlu1 %406 }
 0x163   : > { %v672_v15 = vpack.c.bf16 %v414_v14, %v413_v13  ;;  %v409_v19 = vsel %vm408_vm14, %v405_v17, %v407_v16 }
 0x165   : > { %673 = vmatpush3.bf16.msra.mxu0 %v672_v15 }
 0x166   : > { %663 = vmatprep.subr.mxu0 %v978_v3 }
 0x169   : > { %664 = vmatpush3.msk.msra.mxu0 %vm410_vm9, %v409_v19 }
 0x16a   : > { %666 = vmatmul.mubr.msk.f32.vlgmr.msra.gmra.mrb[0].mxu0 %vm422_vm15, %v415_v18 }
 0x170   : > { %v420_v20 = vpop.permute.xlu0 %419 }
 0x23d   : > { %v494_v21 = vpop.f32.mrb[0].mxu0 }
 0x23e   : > { %v495_v3 = vadd.f32 %v494_v21, %v420_v20  ;;  %v667_v22 = vpop.f32.mrb[1].mxu0 }
 0x240   : > { %v498_v23 = vmax.f32 %v495_v3, 0.0 }
 0x242   : > { %499 = vst [vmem:[%s271_s12] sm:$0xff] %v498_v23 }
 0x243   : > { %885 = shalt.err (!%p882_p2)
}
 0x244   : > { %s886_s7 = scalar_lea.hbm %s1247_s27, 128  ;;  %s890_s9 = scalar_lea.hbm %s1305_s4, 512 }
 0x245   : > { %p887_p9 = scmp.ne.s32.totalorder %s1247_s27, %s886_s7  ;;  %p891_p6 = scmp.lt.u32.totalorder %s1247_s27, %s1305_s4 }
 0x246   : > { %p892_p13 = scmp.lt.u32.totalorder %s890_s9, %s886_s7  ;;  %p894_p8 = scmp.lt.u32.totalorder %s886_s7, %s1247_s27 }
 0x247   : > { %p888_p12 = pnand %p887_p9, %p1326_p0 }
 0x248   : > { %p893_p5 = por %p892_p13, %p891_p6 }
 0x249   : > { %p889_p4 = pneg %p888_p12 }
 0x24a   : > { %p895_p7 = por %p894_p8, %p893_p5 }
 0x24c   : > { %p896_p3 = pnand %p895_p7, %p889_p4 }
 0x24e   : > { %899 = shalt.err (!%p896_p3)
}
 0x24f   : > { %678 = dma.vmem_to_hbm [thread:$0]  (%p1326_p0), %s1249_s26, 128, %s1247_s27, %s501_s18  }
 0x250 PF: > { %p692_p10 = scmp.ge.s32.totalorder %s974_s22, 2  ;;  %s528_s13 = sand.u32 1, %s946_s15  }
 0x251   : > { %p1327_p11 = scmp.ne.s32.totalorder %s1316_s8, 0  ;;  %s529_s12 = scalar_lea.sflag [#allocation4], %s528_s13 }
 0x253   : > { %p688_p1 = pnand %p692_p10, %p1327_p11 }
 0x255   : > { %941 = dma.done.wait (!%p688_p1), %s529_s12, 128  }
 0x256   : > { %943 = vsyncadd (!%p688_p1), %s529_s12, 4294967168  ;;  %s23_s22 = sadd.s32 1, %s974_s22   ;;  %s1328_s5 = sld [smem:[#allocation11_spill]] }
 0x257   : > { %p20_p2 = scmp.ge.s32.totalorder %s23_s22, 6   ;;  %s1329_s15 = smov %s950_s16 }
 0x258   : > { %s1330_s16 = smov %s954_s17  ;;  %s1331_s17 = smov %s1103_s10 }
 0x259   : > { %s1332_s18 = smov %s966_s20  ;;  %s1333_s19 = smov %s970_s21 }
 0x25a   : > { %s1334_s20 = smov %s1337_s25  ;;  %22 = sbr.rel (!%p20_p2) target bundleno = 11 (0xb), region = 94 }
 0x25c   : > { %s1335_s21 = smov %s1328_s5 }
 0x261   :  { %534 = vsyncpa [#allocation3], 1 }
 0x262   :  { %536 = vsyncpa [#allocation3 + $0x1], 1 }
 0x263   :  { %537 = vsyncpa [#allocation6], 1 }
 0x264   :  { %539 = vsyncpa [#allocation6 + $0x1], 1 }
 0x265   :  { %540 = vsyncpa [#allocation4], 1 }
 0x266   :  { %542 = vsyncpa [#allocation4 + $0x1], 1 }

</bundles_post_ra>
